<compile_context>
chip_gen: v6e
topology: v6e:2x2x1
jax: 0.10.0
libtpu: 0.0.40
codegen_flags: <defaults>
</compile_context>

<pallas_src>
import jax
import jax.numpy as jnp
from jax.experimental import pallas as pl
from jax.experimental.pallas import tpu as pltpu

IN_FEATURES = 40
OUT_FEATURES = 128
NORM_EPS = 1e-12  # F.normalize default eps


def _round_up(n, m):
    return ((n + m - 1) // m) * m


def _fc_mfcc_kernel(x_ref, w_ref, b_ref, o_ref):
    # Linear: [TB, 40] @ [40, 128] + [1, 128]
    y = jnp.dot(x_ref[...], w_ref[...], preferred_element_type=jnp.float32)
    y = y + b_ref[...]  # broadcast bias over batch rows

    # F.normalize(dim=1): y / clamp_min(||y||_2, eps)
    #   == y * rsqrt(max(sum(y^2), eps^2))   (sqrt is monotone)
    ss = jnp.sum(y * y, axis=-1, keepdims=True)
    inv = jax.lax.rsqrt(jnp.maximum(ss, NORM_EPS * NORM_EPS))
    y = y * inv

    # ReLU
    o_ref[...] = jnp.maximum(y, 0.0).astype(o_ref.dtype)


def fc_mfcc_forward(x, weight_t, bias, *, block_b=1024, out_dtype=jnp.float32):
    """x: [B, 40] f32, weight_t: [40, 128] f32, bias: [128] f32 -> [B, 128]."""
    B = x.shape[0]

    # Balanced tile selection:
    #   1. target block count n = cdiv(B, block_b)
    #   2. for B >= 16 force at least 2 blocks (keeps both v7x TCs busy)
    #   3. tb = even split of B over n blocks, rounded up to 8 sublanes
    # The final grid block may be ragged; Pallas masks the out-of-range
    # output rows, so no host-side pad or slice is needed.
    n_blocks = max(1, pl.cdiv(B, block_b))
    if B >= 16:
        n_blocks = max(2, n_blocks)
    tb = _round_up(pl.cdiv(B, n_blocks), 8)
    grid = (pl.cdiv(B, tb),)

    bias2d = bias.reshape(1, OUT_FEATURES)

    out_bytes = 2 if out_dtype == jnp.bfloat16 else 4
    bytes_accessed = (
        4 * B * IN_FEATURES                    # x read
        + 4 * IN_FEATURES * OUT_FEATURES       # weight read (once, resident)
        + 4 * OUT_FEATURES                     # bias read (once, resident)
        + out_bytes * B * OUT_FEATURES         # output write (dominant stream)
    )

    return pl.pallas_call(
        _fc_mfcc_kernel,
        out_shape=jax.ShapeDtypeStruct((B, OUT_FEATURES), out_dtype),
        grid_spec=pltpu.PrefetchScalarGridSpec(
            num_scalar_prefetch=0,
            grid=grid,
            in_specs=[
                # x: tiled over batch; feature dim (=40) equals full array dim.
                pl.BlockSpec((tb, IN_FEATURES), lambda i: (i, 0)),
                # weight / bias: constant block index -> loaded once, resident.
                pl.BlockSpec((IN_FEATURES, OUT_FEATURES), lambda i: (0, 0)),
                pl.BlockSpec((1, OUT_FEATURES), lambda i: (0, 0)),
            ],
            out_specs=pl.BlockSpec((tb, OUT_FEATURES), lambda i: (i, 0)),
        ),
        compiler_params=pltpu.CompilerParams(
            # Batch tiles are independent -> shard across TCs on v7x.
            dimension_semantics=("parallel",),
        ),
        cost_estimate=pl.CostEstimate(
            flops=2 * B * IN_FEATURES * OUT_FEATURES,
            transcendentals=B,  # one rsqrt per row
            bytes_accessed=bytes_accessed,
        ),
    )(x, weight_t, bias2d)


def init_params(key):
    """Deterministic parameter init matching the PyTorch module shapes.

    Weight: xavier_uniform_ with gain=1.414 (the module's hard-coded value).
    Bias:   nn.Linear default uniform(-1/sqrt(fan_in), 1/sqrt(fan_in))
            (bias is 1-D so it is not re-initialized by parameter_init).
    """
    kw, kb = jax.random.split(key)
    gain = 1.414
    bound_w = gain * (6.0 / (IN_FEATURES + OUT_FEATURES)) ** 0.5
    # PyTorch stores Linear weight as [out, in]; we keep the transposed
    # [in, out] layout for the kernel's x @ W contraction.
    weight_t = jax.random.uniform(
        kw, (IN_FEATURES, OUT_FEATURES), jnp.float32, -bound_w, bound_w
    )
    bound_b = 1.0 / (IN_FEATURES ** 0.5)
    bias = jax.random.uniform(
        kb, (OUT_FEATURES,), jnp.float32, -bound_b, bound_b
    )
    return weight_t, bias


def reference_forward(x, weight_t, bias):
    y = x @ weight_t + bias
    norm = jnp.maximum(
        jnp.sqrt(jnp.sum(y * y, axis=-1, keepdims=True)), NORM_EPS
    )
    return jnp.maximum(y / norm, 0.0)


if __name__ == "__main__":
    key = jax.random.PRNGKey(0)
    k_params, k_x1, k_x2 = jax.random.split(key, 3)

    weight_t, bias = init_params(k_params)

    # Small batch (the torch.stack over the batch list): single grid block.
    B_small = 8
    x_small = jax.random.normal(k_small := k_x1, (B_small, IN_FEATURES), jnp.float32)
    out_small = jax.block_until_ready(fc_mfcc_forward(x_small, weight_t, bias))
    ref_small = reference_forward(x_small, weight_t, bias)
    assert out_small.shape == (B_small, OUT_FEATURES)
    assert jnp.allclose(out_small, ref_small, atol=1e-5, rtol=1e-5)

    # Larger ragged batch: exercises balanced tiling + masked final block
    # (600 rows -> 2 blocks of tb=304, last block ragged; no pad, no slice).
    B_big = 600
    x_big = jax.random.normal(k_x2, (B_big, IN_FEATURES), jnp.float32)
    out_big = jax.block_until_ready(fc_mfcc_forward(x_big, weight_t, bias))
    ref_big = reference_forward(x_big, weight_t, bias)
    assert out_big.shape == (B_big, OUT_FEATURES)
    assert jnp.allclose(out_big, ref_big, atol=1e-5, rtol=1e-5)

    print("KERNEL_OK")
</pallas_src>

<mosaic_0001>
module attributes {stable_mosaic.version = 11 : i64} {
  func.func @_fc_mfcc_kernel(%arg0: i32, %arg1: memref<8x40xf32, #tpu.memory_space<vmem>>, %arg2: memref<40x128xf32, #tpu.memory_space<vmem>>, %arg3: memref<1x128xf32, #tpu.memory_space<vmem>>, %arg4: memref<8x128xf32, #tpu.memory_space<vmem>>) attributes {dimension_semantics = [#tpu.dimension_semantics<parallel>], iteration_bounds = array<i64: 1>, scalar_prefetch = 0 : i64, scratch_operands = 0 : i64, tpu.core_type = #tpu.core_type<tc>, window_params = [{transform_indices = @transform_0, window_bounds = array<i64: 8, 40>}, {pipeline_mode = #tpu.pipeline_mode<synchronous>, transform_indices = @transform_1, window_bounds = array<i64: 40, 128>}, {pipeline_mode = #tpu.pipeline_mode<synchronous>, transform_indices = @transform_2, window_bounds = array<i64: 1, 128>}, {transform_indices = @transform_3, window_bounds = array<i64: 8, 128>}]} {
    %c0 = arith.constant 0 : index
    %c0_0 = arith.constant 0 : index
    %0 = vector.load %arg1[%c0, %c0_0] : memref<8x40xf32, #tpu.memory_space<vmem>>, vector<8x40xf32>
    %c0_1 = arith.constant 0 : index
    %c0_2 = arith.constant 0 : index
    %1 = vector.load %arg2[%c0_1, %c0_2] : memref<40x128xf32, #tpu.memory_space<vmem>>, vector<40x128xf32>
    %cst = arith.constant dense<0.000000e+00> : vector<8x128xf32>
    %2 = tpu.matmul %0, %1, %cst {dimension_numbers = #tpu.dot_dimension_numbers<[1], [0], [0], [1], [0, 0, 1, 1], [], []>} : vector<8x40xf32>, vector<40x128xf32>, vector<8x128xf32> -> vector<8x128xf32>
    %c0_3 = arith.constant 0 : index
    %c0_4 = arith.constant 0 : index
    %3 = vector.load %arg3[%c0_3, %c0_4] : memref<1x128xf32, #tpu.memory_space<vmem>>, vector<1x128xf32>
    %4 = vector.broadcast %3 : vector<1x128xf32> to vector<8x128xf32>
    %5 = arith.addf %2, %4 : vector<8x128xf32>
    %6 = arith.mulf %5, %5 : vector<8x128xf32>
    %cst_5 = arith.constant dense<0.000000e+00> : vector<8xf32>
    %7 = vector.multi_reduction <add>, %6, %cst_5 [1] : vector<8x128xf32> to vector<8xf32>
    %8 = vector.shape_cast %7 : vector<8xf32> to vector<8x1xf32>
    %cst_6 = arith.constant 1.000000e-24 : f32
    %9 = vector.broadcast %cst_6 : f32 to vector<8x1xf32>
    %10 = arith.maximumf %8, %9 : vector<8x1xf32>
    %11 = math.rsqrt %10 : vector<8x1xf32>
    %12 = vector.broadcast %11 : vector<8x1xf32> to vector<8x128xf32>
    %13 = arith.mulf %5, %12 : vector<8x128xf32>
    %cst_7 = arith.constant 0.000000e+00 : f32
    %14 = vector.broadcast %cst_7 : f32 to vector<8x128xf32>
    %15 = arith.maximumf %13, %14 : vector<8x128xf32>
    %c0_8 = arith.constant 0 : index
    %c0_9 = arith.constant 0 : index
    %16 = vector.load %arg4[%c0_8, %c0_9] : memref<8x128xf32, #tpu.memory_space<vmem>>, vector<8x128xf32>
    tpu.vector_store %arg4[%c0_8, %c0_9], %15 {strides = array<i32>} : memref<8x128xf32, #tpu.memory_space<vmem>>, vector<8x128xf32>,
    return
  }
  func.func @transform_0(%arg0: i32) -> (i32, i32) {
    %c0_i32 = arith.constant 0 : i32
    %c0_i32_0 = arith.constant 0 : i32
    return %arg0, %c0_i32 : i32, i32
  }
  func.func @transform_1(%arg0: i32) -> (i32, i32) {
    %c0_i32 = arith.constant 0 : i32
    %c0_i32_0 = arith.constant 0 : i32
    %c0_i32_1 = arith.constant 0 : i32
    return %c0_i32, %c0_i32_0 : i32, i32
  }
  func.func @transform_2(%arg0: i32) -> (i32, i32) {
    %c0_i32 = arith.constant 0 : i32
    %c0_i32_0 = arith.constant 0 : i32
    %c0_i32_1 = arith.constant 0 : i32
    return %c0_i32, %c0_i32_0 : i32, i32
  }
  func.func @transform_3(%arg0: i32) -> (i32, i32) {
    %c0_i32 = arith.constant 0 : i32
    %c0_i32_0 = arith.constant 0 : i32
    return %arg0, %c0_i32 : i32, i32
  }
}

</mosaic_0001>

<bundles_post_ra>
// kernel: tpu_custom_call.1
= control target key start
LH: loop header
LB: loop body
LE: loop exit
PB: predicated region body
PF: predicated region fallthrough
CT: control target
= control target key end

     0   :  { %8 = vsyncpa [#allocation3], 0  ;;  %s287_s0 = inlined_call_operand.hbm [shape: f32[8,40], index: 0, kind: input, shape index: {}]   ;;  %s288_s1 = inlined_call_operand.hbm [shape: f32[40,128], index: 1, kind: input, shape index: {}]   ;;  %s289_s2 = inlined_call_operand.vmem [shape: f32[1,128], index: 2, kind: input, shape index: {}]   ;;  %s290_s3 = inlined_call_operand.hbm [shape: f32[8,128], index: 3, kind: output, shape index: {}]  }
   0x1   :  { %9 = vsyncpa [#allocation6], 0 }
   0x2   :  { %10 = vsyncpa [#allocation4], 0  ;;  %s248_s12 = smov [#allocation2]   ;;  %s249_s14 = smov [#allocation5]  }
   0x3   :  { %s17_s13 = sshll.u32 %s248_s12, 4  ;;  %s26_s15 = sshll.u32 %s249_s14, 4  ;;  %s18_s13 = int_to_ptr.vmem [resolvable:$true] %s17_s13  ;;  %s27_s15 = int_to_ptr.vmem [resolvable:$true] %s26_s15 }
   0x4   :  { %s190_s16 = scalar_lea.vmem %s18_s13, 128  ;;  %p195_p1 = scmp.lt.s32.totalorder %s18_s13, %s18_s13 }
   0x5   :  { %p191_p0 = scmp.ne.s32.totalorder %s18_s13, %s190_s16  ;;  %p196_p2 = scmp.lt.s32.totalorder %s190_s16, %s190_s16 }
   0x7   :  { %p197_p3 = por %p196_p2, %p195_p1 }
   0x9   :  { %p198_p4 = pnand %p197_p3, %p191_p0 }
   0xb   :  { %201 = shalt.err (!%p198_p4)
}
   0xc   :  { %20 = dma.hbm_to_vmem [thread:$0]  %s287_s0, 128, %s18_s13, [#allocation3]  }
   0xd   :  { %s210_s19 = scalar_lea.vmem %s27_s15, 640  ;;  %p215_p6 = scmp.lt.s32.totalorder %s27_s15, %s27_s15 }
   0xe   :  { %p211_p5 = scmp.ne.s32.totalorder %s27_s15, %s210_s19  ;;  %p216_p7 = scmp.lt.s32.totalorder %s210_s19, %s210_s19 }
  0x10   :  { %p217_p8 = por %p216_p7, %p215_p6 }
  0x12   :  { %p218_p9 = pnand %p217_p8, %p211_p5 }
  0x14   :  { %221 = shalt.err (!%p218_p9)
}
  0x15   :  { %s250_s20 = smov 128   ;;  %s251_s21 = smov 8  }
  0x16   :  { %32 = dma.hbm_to_vmem [thread:$0]  %s288_s1, 640, %s27_s15, [#allocation6], %s250_s20, %s250_s20, %s251_s21  }
  0x17   :  { %242 = dma.done.wait [#allocation3], 128  }
  0x18   :  { %243 = vsyncadd [#allocation3], 4294967168 }
  0x19   :  { %244 = dma.done.wait [#allocation6], 640  }
  0x1a   :  { %245 = vsyncadd [#allocation6], 4294966656  ;;  %v252_v0 = vmov 0.0   ;;  %vm253_vm0 = vmmov 0   ;;  %v46_v1 = vld [vmem:[#allocation5 + $0x20] sm:$0xff]  ;;  %v45_v2 = vld [vmem:[#allocation5 + $0x18] sm:$0xff] }
  0x1b   :  { %160 = vmatprep.subr.mxu0 %v252_v0  ;;  %170 = vmatprep.mubr.msk.f32.mxu0 %vm253_vm0, %v252_v0  ;;  %v44_v3 = vld [vmem:[#allocation5 + $0x10] sm:$0xff]  ;;  %v43_v4 = vld [vmem:[#allocation5 + $0x8] sm:$0xff]  ;;  %v42_v5 = vld [vmem:[#allocation5] sm:$0xff]  ;;  %vm54_vm1 = vcmask 326656   ;;  %s254_s24 = smov [#allocation7]  }
  0x1c   :  { %161 = vmatpush3.msra.mxu0 %v46_v1  ;;  %v41_v6 = vld [vmem:[#allocation2] sm:$0xff]  ;;  %s142_s25 = sshll.u32 %s254_s24, 4  ;;  %s143_s25 = int_to_ptr.vmem [resolvable:$true] %s142_s25 }
  0x1d   :  { %162 = vmatprep.subr.mxu0 %v252_v0  ;;  %v152_v7 = vld [vmem:[%s289_s2] ss:$0 sm:$0xff]  ;;  %s222_s26 = scalar_lea.vmem %s143_s25, 128  ;;  %p227_p11 = scmp.lt.s32.totalorder %s143_s25, %s143_s25 }
  0x1e   :  { %163 = vmatpush3.msra.mxu0 %v45_v2  ;;  %p223_p10 = scmp.ne.s32.totalorder %s143_s25, %s222_s26  ;;  %p228_p12 = scmp.lt.s32.totalorder %s222_s26, %s222_s26 }
  0x1f   :  { %164 = vmatprep.subr.mxu0 %v252_v0 }
  0x20   :  { %165 = vmatpush3.msra.mxu0 %v44_v3  ;;  %p229_p13 = por %p228_p12, %p227_p11 }
  0x21   :  { %166 = vmatprep.subr.mxu0 %v252_v0 }
  0x22   :  { %167 = vmatpush3.msra.mxu0 %v43_v4  ;;  %p230_p0 = pnand %p229_p13, %p223_p10 }
  0x23   :  { %168 = vmatprep.subr.mxu0 %v252_v0 }
  0x24   :  { %169 = vmatpush3.msra.mxu0 %v42_v5 }
  0x25   :  { %171 = vmatmul.mubr.msk.f32.vlgmr.msra.gmra.mxu0 %vm54_vm1, %v41_v6 }
  0xe5   :  { %v124_v8 = vpop.f32.mrf.mxu0 }
  0xe6   :  { %v125_v9 = vadd.f32 %v152_v7, %v124_v8 }
  0xe7   :  { %v172_v10 = vpop.f32.mrf.mxu0 }
  0xe8   :  { %v128_v11 = vmul.f32 %v125_v9, %v125_v9 }
  0xea   :  { %129 = vadd.xlane.f32.xlu0 %v128_v11 }
 0x173   :  { %v130_v12 = vpop.xlane.xlu0 %129 }
 0x174   :  { %v131_v13 = vmax.f32 %v130_v12, 1e-24 }
 0x176   :  { %180 = vrsqrt.f32 %v131_v13 }
 0x183   :  { %v181_v14 = vpop.eup %180 }
 0x184   :  { %v133_v15 = vmul.f32 %v181_v14, %v125_v9 }
 0x186   :  { %v134_v16 = vmax.f32 %v133_v15, 0.0 }
 0x188   :  { %135 = vst [vmem:[#allocation7] sm:$0xff] %v134_v16 }
 0x189   :  { %233 = shalt.err (!%p230_p0)
}
 0x18a   :  { %145 = dma.vmem_to_hbm [thread:$0]  %s143_s25, 128, %s290_s3, [#allocation4]  }
 0x18b   :  { %246 = dma.done.wait [#allocation4], 128  }
 0x18c   :  { %247 = vsyncadd [#allocation4], 4294967168 }
 0x18d   :  { %149 = vsyncpa [#allocation3], 1 }
 0x18e   :  { %150 = vsyncpa [#allocation6], 1 }
 0x18f   :  { %151 = vsyncpa [#allocation4], 1 }

</bundles_post_ra>
